<compile_context>
chip_gen: v7x
topology: tpu7x:2x2x1
jax: 0.10.0
libtpu: 0.0.40
codegen_flags: <defaults>
</compile_context>

<pallas_src>
import functools

import jax
import jax.numpy as jnp
from jax import lax
from jax.experimental import pallas as pl
from jax.experimental.pallas import tpu as pltpu


def _round_up(n, m):
    return ((n + m - 1) // m) * m


def _disp_regression_kernel(x_ref, o_ref, acc_ref, *, d_total, d_chunk):
    # x_ref:   (d_chunk, TR, L)   slice of the probability volume
    # o_ref:   (TR, L) float32    expected-disparity tile (written on last k)
    # acc_ref: (TR, L) float32    running weighted sum, resident across k steps
    k = pl.program_id(2)

    @pl.when(k == 0)
    def _():
        acc_ref[...] = jnp.zeros_like(acc_ref)

    needs_mask = (d_total % d_chunk) != 0  # static: last D chunk is partial

    def body(d, acc):
        idx = k * d_chunk + d                      # absolute disparity value
        xv = x_ref[d].astype(jnp.float32)
        if needs_mask:
            xv = jnp.where(idx < d_total, xv, 0.0)
        return acc + xv * idx.astype(jnp.float32)

    acc_ref[...] = lax.fori_loop(
        0, d_chunk, body, acc_ref[...],
        unroll=True if d_chunk <= 16 else 8,
    )

    @pl.when(k == pl.num_programs(2) - 1)
    def _():
        o_ref[...] = acc_ref[...].astype(o_ref.dtype)


def disparity_regression(x, *, tile_budget_bytes=None, vmem_limit_bytes=None):
    """Pallas TPU equivalent of disparityregression.forward.

    x: [B, D, H, W] probability volume over D disparity hypotheses.
    returns: float32 [B, H, W] expected disparity = sum_d x[:, d] * d.
    """
    B, D, H, W = x.shape
    HW = H * W
    LANES = 128
    itemsize = jnp.dtype(x.dtype).itemsize
    # sublane packing: 8 rows for 32-bit, 16 for 16-bit, 32 for 8-bit dtypes
    sub = max(8, 32 // max(itemsize, 1))

    # Per-generation VMEM budgets (v5e/v6e: 128 MiB; v7x: 64 MiB per TC).
    if tile_budget_bytes is None or vmem_limit_bytes is None:
        try:
            vmem_cap = pltpu.get_tpu_info().vmem_capacity_bytes
        except Exception:
            vmem_cap = 64 << 20
        if vmem_cap >= (100 << 20):
            tile_budget_bytes = tile_budget_bytes or (40 << 20)
            vmem_limit_bytes = vmem_limit_bytes or (96 << 20)
        else:
            tile_budget_bytes = tile_budget_bytes or (20 << 20)
            vmem_limit_bytes = vmem_limit_bytes or (56 << 20)

    # Layout: lane-dense (rows, 128) when H*W divides 128 (free reshape, no
    # pad copy); otherwise tile H directly with the full W as the lane dim.
    if HW % LANES == 0:
        rows, lanes = HW // LANES, LANES
        x_t = x.reshape(B, D, rows, lanes)
    else:
        rows, lanes = H, W
        x_t = x

    # Disparity chunking: only when even the minimum row tile would overflow
    # the double-buffered input budget (very large maxdisp).
    min_tr = min(rows, sub)
    bytes_per_d_per_row = lanes * itemsize
    if 2 * D * min_tr * bytes_per_d_per_row > tile_budget_bytes:
        d_chunk = max(1, tile_budget_bytes // (2 * min_tr * bytes_per_d_per_row))
        d_chunk = min(d_chunk, D)
    else:
        d_chunk = D
    d_steps = pl.cdiv(D, d_chunk)

    # Row tile: as big as the budget allows; sublane-aligned unless it covers
    # the full row extent.
    max_tr = tile_budget_bytes // (2 * d_chunk * bytes_per_d_per_row)
    if max_tr >= rows:
        tile_rows = rows
    else:
        tile_rows = max(sub, (max_tr // sub) * sub)
    # Keep >=2 row tiles when B == 1 so both v7x TensorCores get work.
    if B == 1 and tile_rows >= rows and rows > sub:
        tile_rows = min(rows, _round_up(pl.cdiv(rows, 2), sub))

    row_tiles = pl.cdiv(rows, tile_rows)

    kernel = functools.partial(_disp_regression_kernel, d_total=D, d_chunk=d_chunk)

    out = pl.pallas_call(
        kernel,
        out_shape=jax.ShapeDtypeStruct((B, rows, lanes), jnp.float32),
        grid=(B, row_tiles, d_steps),
        in_specs=[
            pl.BlockSpec((None, d_chunk, tile_rows, lanes),
                         lambda b, r, k: (b, k, r, 0)),
        ],
        out_specs=pl.BlockSpec((None, tile_rows, lanes),
                               lambda b, r, k: (b, r, 0)),
        scratch_shapes=[pltpu.VMEM((tile_rows, lanes), jnp.float32)],
        compiler_params=pltpu.CompilerParams(
            dimension_semantics=("parallel", "parallel", "arbitrary"),
            vmem_limit_bytes=vmem_limit_bytes,
        ),
    )(x_t)

    return out.reshape(B, H, W)


if __name__ == "__main__":
    key = jax.random.PRNGKey(0)
    B, maxdisp, H, W = 2, 4, 16, 16

    logits = jax.random.normal(key, (B, maxdisp, H, W), dtype=jnp.float32)
    # x: softmax-normalized probability volume over the disparity axis
    x = jax.nn.softmax(logits, axis=1)

    out = disparity_regression(x)
    out = jax.block_until_ready(out)

    # pure-JAX reference (matches the PyTorch module spec)
    disp = jnp.arange(maxdisp, dtype=jnp.float32)[None, :, None, None]
    ref = jnp.sum(x.astype(jnp.float32) * disp, axis=1)
    assert out.shape == (B, H, W)
    assert out.dtype == jnp.float32
    assert jnp.allclose(out, ref, atol=1e-5, rtol=1e-5)

    print("KERNEL_OK")
</pallas_src>

<mosaic_0001>
module attributes {stable_mosaic.version = 11 : i64} {
  func.func @_disp_regression_kernel(%arg0: i32, %arg1: i32, %arg2: i32, %arg3: memref<1x4x2x128xf32, #tpu.memory_space<vmem>>, %arg4: memref<1x2x128xf32, #tpu.memory_space<vmem>>, %arg5: memref<2x128xf32, #tpu.memory_space<vmem>>) attributes {dimension_semantics = [#tpu.dimension_semantics<parallel>, #tpu.dimension_semantics<parallel>, #tpu.dimension_semantics<arbitrary>], iteration_bounds = array<i64: 2, 1, 1>, scalar_prefetch = 0 : i64, scratch_operands = 1 : i64, tpu.core_type = #tpu.core_type<tc>, window_params = [{transform_indices = @transform_0, window_bounds = array<i64: 1, 4, 2, 128>}, {transform_indices = @transform_1, window_bounds = array<i64: 1, 2, 128>}]} {
    %c0_i32 = arith.constant 0 : i32
    %0 = arith.cmpi eq, %arg2, %c0_i32 : i32
    %1 = arith.extui %0 : i1 to i32
    %c0_i32_0 = arith.constant 0 : i32
    %2 = arith.cmpi ne, %1, %c0_i32_0 : i32
    scf.if %2 {
      %cst = arith.constant 0.000000e+00 : f32
      %44 = vector.broadcast %cst : f32 to vector<2x128xf32>
      %c0_23 = arith.constant 0 : index
      %c0_24 = arith.constant 0 : index
      %45 = vector.load %arg5[%c0_23, %c0_24] : memref<2x128xf32, #tpu.memory_space<vmem>>, vector<2x128xf32>
      tpu.vector_store %arg5[%c0_23, %c0_24], %44 {strides = array<i32>} : memref<2x128xf32, #tpu.memory_space<vmem>>, vector<2x128xf32>,
    } else {
    }
    %c0 = arith.constant 0 : index
    %c0_1 = arith.constant 0 : index
    %3 = vector.load %arg5[%c0, %c0_1] : memref<2x128xf32, #tpu.memory_space<vmem>>, vector<2x128xf32>
    %c0_i32_2 = arith.constant 0 : i32
    %c4_i32 = arith.constant 4 : i32
    %4 = arith.muli %arg2, %c4_i32 : i32
    %5 = arith.addi %4, %c0_i32_2 : i32
    %c0_3 = arith.constant 0 : index
    %6 = arith.index_cast %c0_i32_2 : i32 to index
    %c0_4 = arith.constant 0 : index
    %c0_5 = arith.constant 0 : index
    %7 = vector.load %arg3[%c0_3, %6, %c0_4, %c0_5] : memref<1x4x2x128xf32, #tpu.memory_space<vmem>>, vector<1x1x2x128xf32>
    %8 = vector.shape_cast %7 : vector<1x1x2x128xf32> to vector<2x128xf32>
    %9 = arith.sitofp %5 : i32 to f32
    %10 = vector.broadcast %9 : f32 to vector<2x128xf32>
    %11 = arith.mulf %8, %10 : vector<2x128xf32>
    %12 = arith.addf %3, %11 : vector<2x128xf32>
    %c1_i32 = arith.constant 1 : i32
    %c4_i32_6 = arith.constant 4 : i32
    %13 = arith.muli %arg2, %c4_i32_6 : i32
    %14 = arith.addi %13, %c1_i32 : i32
    %c0_7 = arith.constant 0 : index
    %15 = arith.index_cast %c1_i32 : i32 to index
    %c0_8 = arith.constant 0 : index
    %c0_9 = arith.constant 0 : index
    %16 = vector.load %arg3[%c0_7, %15, %c0_8, %c0_9] : memref<1x4x2x128xf32, #tpu.memory_space<vmem>>, vector<1x1x2x128xf32>
    %17 = vector.shape_cast %16 : vector<1x1x2x128xf32> to vector<2x128xf32>
    %18 = arith.sitofp %14 : i32 to f32
    %19 = vector.broadcast %18 : f32 to vector<2x128xf32>
    %20 = arith.mulf %17, %19 : vector<2x128xf32>
    %21 = arith.addf %12, %20 : vector<2x128xf32>
    %c2_i32 = arith.constant 2 : i32
    %c4_i32_10 = arith.constant 4 : i32
    %22 = arith.muli %arg2, %c4_i32_10 : i32
    %23 = arith.addi %22, %c2_i32 : i32
    %c0_11 = arith.constant 0 : index
    %24 = arith.index_cast %c2_i32 : i32 to index
    %c0_12 = arith.constant 0 : index
    %c0_13 = arith.constant 0 : index
    %25 = vector.load %arg3[%c0_11, %24, %c0_12, %c0_13] : memref<1x4x2x128xf32, #tpu.memory_space<vmem>>, vector<1x1x2x128xf32>
    %26 = vector.shape_cast %25 : vector<1x1x2x128xf32> to vector<2x128xf32>
    %27 = arith.sitofp %23 : i32 to f32
    %28 = vector.broadcast %27 : f32 to vector<2x128xf32>
    %29 = arith.mulf %26, %28 : vector<2x128xf32>
    %30 = arith.addf %21, %29 : vector<2x128xf32>
    %c3_i32 = arith.constant 3 : i32
    %c4_i32_14 = arith.constant 4 : i32
    %31 = arith.muli %arg2, %c4_i32_14 : i32
    %32 = arith.addi %31, %c3_i32 : i32
    %c0_15 = arith.constant 0 : index
    %33 = arith.index_cast %c3_i32 : i32 to index
    %c0_16 = arith.constant 0 : index
    %c0_17 = arith.constant 0 : index
    %34 = vector.load %arg3[%c0_15, %33, %c0_16, %c0_17] : memref<1x4x2x128xf32, #tpu.memory_space<vmem>>, vector<1x1x2x128xf32>
    %35 = vector.shape_cast %34 : vector<1x1x2x128xf32> to vector<2x128xf32>
    %36 = arith.sitofp %32 : i32 to f32
    %37 = vector.broadcast %36 : f32 to vector<2x128xf32>
    %38 = arith.mulf %35, %37 : vector<2x128xf32>
    %39 = arith.addf %30, %38 : vector<2x128xf32>
    %c4_i32_18 = arith.constant 4 : i32
    %c0_19 = arith.constant 0 : index
    %c0_20 = arith.constant 0 : index
    %40 = vector.load %arg5[%c0_19, %c0_20] : memref<2x128xf32, #tpu.memory_space<vmem>>, vector<2x128xf32>
    tpu.vector_store %arg5[%c0_19, %c0_20], %39 {strides = array<i32>} : memref<2x128xf32, #tpu.memory_space<vmem>>, vector<2x128xf32>,
    %c0_i32_21 = arith.constant 0 : i32
    %41 = arith.cmpi eq, %arg2, %c0_i32_21 : i32
    %42 = arith.extui %41 : i1 to i32
    %c0_i32_22 = arith.constant 0 : i32
    %43 = arith.cmpi ne, %42, %c0_i32_22 : i32
    scf.if %43 {
      %c0_23 = arith.constant 0 : index
      %c0_24 = arith.constant 0 : index
      %44 = vector.load %arg5[%c0_23, %c0_24] : memref<2x128xf32, #tpu.memory_space<vmem>>, vector<2x128xf32>
      %c0_25 = arith.constant 0 : index
      %c0_26 = arith.constant 0 : index
      %c0_27 = arith.constant 0 : index
      %45 = vector.load %arg4[%c0_25, %c0_26, %c0_27] : memref<1x2x128xf32, #tpu.memory_space<vmem>>, vector<1x2x128xf32>
      %46 = vector.shape_cast %45 : vector<1x2x128xf32> to vector<2x128xf32>
      %47 = vector.shape_cast %44 : vector<2x128xf32> to vector<1x2x128xf32>
      tpu.vector_store %arg4[%c0_25, %c0_26, %c0_27], %47 {strides = array<i32>} : memref<1x2x128xf32, #tpu.memory_space<vmem>>, vector<1x2x128xf32>,
    } else {
    }
    return
  }
  func.func @transform_0(%arg0: i32, %arg1: i32, %arg2: i32) -> (i32, i32, i32, i32) {
    %c0_i32 = arith.constant 0 : i32
    %c0_i32_0 = arith.constant 0 : i32
    return %arg0, %arg2, %arg1, %c0_i32 : i32, i32, i32, i32
  }
  func.func @transform_1(%arg0: i32, %arg1: i32, %arg2: i32) -> (i32, i32, i32) {
    %c0_i32 = arith.constant 0 : i32
    %c0_i32_0 = arith.constant 0 : i32
    return %arg0, %arg1, %c0_i32 : i32, i32, i32
  }
}

</mosaic_0001>

<bundles_post_ra>
// kernel: tpu_custom_call.1
= control target key start
LH: loop header
LB: loop body
LE: loop exit
PB: predicated region body
PF: predicated region fallthrough
CT: control target
= control target key end

     0   :  { %6 = vsyncpa [#allocation4], 0  ;;  %s690_s0 = inlined_call_operand.hbm [shape: f32[2,4,2,128], index: 0, kind: input, shape index: {}]   ;;  %s691_s1 = inlined_call_operand.hbm [shape: f32[2,2,128], index: 1, kind: output, shape index: {}]  }
   0x1   :  { %8 = vsyncpa [#allocation4 + $0x1], 0 }
   0x2   :  { %9 = vsyncpa [#allocation5], 0 }
   0x3   :  { %11 = vsyncpa [#allocation5 + $0x1], 0  ;;  %s516_s6 = smov 0   ;;  %s518_s7 = smov 0  }
   0x4   :  { %s520_s8 = smov 0   ;;  %s522_s9 = smov 0  }
   0x5   :  { %s524_s10 = smov 0   ;;  %s526_s11 = smov 0  }
   0x6 LB: > { %s304_s12 = sadd.s32 4294967295, %s499_s11   ;;  %s305_s13 = sadd.s32 4294967294, %s499_s11   ;;  %s499_s11 = sphi %s526_s11, %s17_s11   ;;  %s495_s10 = sphi %s524_s10, %s706_s10   ;;  %s491_s9 = sphi %s522_s9, %s705_s9   ;;  %s487_s8 = sphi %s520_s8, %s704_s8   ;;  %s483_s7 = sphi %s518_s7, %s703_s7   ;;  %s479_s6 = sphi %s516_s6, %s702_s6  }
   0x7   : > { %s36_s14 = sadd.s32 1, %s495_s10  ;;  %s47_s15 = sadd.s32 1, %s487_s8 }
   0x8   : > { %p38_p0 = scmp.ge.s32.totalorder %s36_s14, 2  ;;  %p54_p1 = scmp.ne.s32.totalorder %s487_s8, %s483_s7 }
   0x9   : > { %p55_p2 = scmp.eq.s32.totalorder %s499_s11, 0  ;;  %p60_p3 = scmp.ne.s32.totalorder %s483_s7, %s479_s6 }
   0xa   : > { %s708_s14 = smov (%p38_p0, %s36_s14), 0  ;;  %p61_p5 = scmp.eq.s32.totalorder %s304_s12, 0 }
   0xb   : > { %p557_p4 = por %p55_p2, %p54_p1  ;;  %s40_s17 = ssub.s32 %s495_s10, %s708_s14 }
   0xc   : > { %p86_p6 = scmp.eq.s32.totalorder %s304_s12, 1  ;;  %p45_p7 = scmp.eq.s32.totalorder %s40_s17, 0 }
   0xd   : > { %p563_p8 = por %p61_p5, %p60_p3  ;;  %p92_p10 = scmp.eq.s32.totalorder %s305_s13, 1 }
   0xe   : > { %p567_p9 = por %p86_p6, %p54_p1  ;;  %p334_p13 = scmp.lt.s32.totalorder %s499_s11, 2 }
   0xf   : > { %s572_s20 = scalar_select %p45_p7, %s487_s8, %s47_s15  }
  0x10   : > { %s695_s19 = scalar_select %p567_p9, 1, 0 }
  0x11   : > { %p574_p11 = por %p92_p10, %p60_p3  ;;  %s112_s22 = sand.u32 1, %s487_s8  }
  0x12   : > { %s308_s23 = sshll.u32 %s112_s22, 3  ;;  %s321_s24 = sshll.u32 %s495_s10, 7 }
  0x13   : > { %s696_s21 = scalar_select %p574_p11, 1, 0 }
  0x14   : > { %s585_s27 = scalar_lea.hbm %s690_s0, %s321_s24  ;;  %s116_s28 = scalar_lea.vmem [#allocation3], %s308_s23 }
  0x15   : > { %s126_s29 = sshll.u32 %s116_s28, 4  ;;  %p591_p0 = pnand %p334_p13, %p557_p4  ;;  %s587_s29 = int_to_ptr.vmem [resolvable:$true] %s126_s29 }
  0x16   : > { %s596_s2 = scalar_lea.sflag [#allocation4], %s112_s22  ;;  %s387_s3 = scalar_lea.hbm %s585_s27, 128 }
  0x17   : > { %p388_p2 = scmp.ne.s32.totalorder %s585_s27, %s387_s3  ;;  %p389_p3 = pneg %p591_p0 }
  0x18   : > { %s392_s12 = scalar_lea.hbm %s690_s0, 256  ;;  %p393_p4 = scmp.lt.u32.totalorder %s585_s27, %s690_s0 }
  0x19   : > { %p390_p5 = pnand %p389_p3, %p388_p2  ;;  %p394_p7 = scmp.lt.u32.totalorder %s392_s12, %s387_s3 }
  0x1a   : > { %p396_p13 = scmp.lt.u32.totalorder %s387_s3, %s585_s27 }
  0x1b   : > { %p391_p6 = pneg %p390_p5  ;;  %p395_p10 = por %p394_p7, %p393_p4 }
  0x1d   : > { %p397_p12 = por %p396_p13, %p395_p10 }
  0x1f   : > { %p398_p1 = pnand %p397_p12, %p391_p6 }
  0x21   : > { %401 = shalt.err (!%p398_p1)
}
  0x22   : > { %s402_s16 = scalar_lea.vmem %s587_s29, 128  ;;  %s501_s17 = smov [#allocation3]  }
  0x23   : > { %p403_p2 = scmp.ne.s32.totalorder %s587_s29, %s402_s16  ;;  %s407_s22 = sshll.u32 %s501_s17, 4  ;;  %s408_s22 = int_to_ptr.vmem [resolvable:$false] %s407_s22 }
  0x24   : > { %s409_s23 = scalar_lea.vmem %s408_s22, 256  ;;  %p410_p9 = scmp.lt.s32.totalorder %s587_s29, %s408_s22 }
  0x25   : > { %p405_p5 = pnand %p403_p2, %p389_p3  ;;  %p411_p4 = scmp.lt.s32.totalorder %s409_s23, %s402_s16 }
  0x27   : > { %p406_p11 = pneg %p405_p5  ;;  %p412_p7 = por %p411_p4, %p410_p9 }
  0x29   : > { %p413_p10 = pnand %p412_p7, %p406_p11 }
  0x2b   : > { %416 = shalt.err (!%p413_p10)
}
  0x2c   : > { %s502_s24 = smov 32   ;;  %s503_s25 = smov 2  }
  0x2d   : > { %329 = dma.hbm_to_vmem [thread:$0]  (!%p591_p0), %s585_s27, 128, %s587_s29, %s596_s2, %s502_s24, %s502_s24, %s503_s25  }
  0x2e   : > { %p134_p12 = scmp.lt.s32.totalorder %s499_s11, 3  ;;  %p698_p1 = scmp.ge.s32.totalorder %s499_s11, 1 }
  0x30   : > { %p135_p3 = pnand %p698_p1, %p134_p12 }
  0x31   : > { %s628_s26 = sand.u32 (!%p135_p3), 1, %s483_s7  }
  0x32   : > { %138 = sbr.rel (%p135_p3) target bundleno = 97 (0x61), region = 24  ;;  %s312_s28 = sshll.u32 (!%p135_p3), %s628_s26, 3 }
  0x33   : > { %s141_s3 = scalar_lea.sflag (!%p135_p3), [#allocation4], %s628_s26  ;;  %s144_s4 = scalar_lea.vmem (!%p135_p3), [#allocation3], %s312_s28 }
  0x39   : > { %470 = dma.done.wait (%p563_p8), %s141_s3, 128  }
  0x3a   : > { %472 = vsyncadd (%p563_p8), %s141_s3, 4294967168  ;;  %v504_v0 = vmov 0.0   ;;  %v171_v1 = vld [vmem:[%s144_s4] sm:$0x3]  ;;  %v315_v2 = vld [vmem:[%s144_s4 + $0x4] sm:$0x3] }
  0x3b   : > { %168 = vst [vmem:[#allocation2] sm:$0x3] %v504_v0  ;;  %v174_v4 = vmul.f32 0.0, %v171_v1  ;;  %v314_v5 = vld [vmem:[%s144_s4 + $0x2] sm:$0x3]  ;;  %v188_v8 = vmul.f32 2.0, %v315_v2 }
  0x3c   : > { %v316_v6 = vld [vmem:[%s144_s4 + $0x6] sm:$0x3]  ;;  %s313_s27 = sshll.u32 %s628_s26, 1  ;;  %s318_s30 = sshll.u32 %s491_s9, 5 }
  0x3d   : > { %v195_v10 = vmul.f32 3.0, %v316_v6  ;;  %s162_s18 = scalar_lea.vmem [#allocation6], %s313_s27  ;;  %s643_s12 = scalar_lea.hbm %s691_s1, %s318_s30 }
  0x3e   : > { %s218_s29 = sshll.u32 %s162_s18, 4  ;;  %s204_s13 = scalar_lea.sflag [#allocation5], %s628_s26  ;;  %s638_s29 = int_to_ptr.vmem [resolvable:$true] %s218_s29 }
  0x3f   : > { %s417_s15 = scalar_lea.vmem %s638_s29, 32  ;;  %p699_p9 = scmp.ne.s32.totalorder %s695_s19, 0 }
  0x40   : > { %p418_p8 = scmp.ne.s32.totalorder %s638_s29, %s417_s15  ;;  %s505_s16 = smov [#allocation6]  }
  0x41   : > { %s421_s9 = sshll.u32 %s505_s16, 4  ;;  %s422_s9 = int_to_ptr.vmem [resolvable:$false] %s421_s9 }
  0x42   : > { %v169_v3 = vld [vmem:[#allocation2] sm:$0x3]  ;;  %p419_p11 = pnand %p418_p8, %p699_p9  ;;  %s423_s17 = scalar_lea.vmem %s422_s9, 64 }
  0x43   : > { %v175_v7 = vadd.f32 %v174_v4, %v169_v3  ;;  %p424_p6 = scmp.lt.s32.totalorder %s638_s29, %s422_s9  ;;  %p425_p13 = scmp.lt.s32.totalorder %s423_s17, %s417_s15 }
  0x44   : > { %p420_p0 = pneg %p419_p11 }
  0x45   : > { %v182_v9 = vadd.f32 %v314_v5, %v175_v7  ;;  %p426_p2 = por %p425_p13, %p424_p6 }
  0x47   : > { %v189_v11 = vadd.f32 %v188_v8, %v182_v9  ;;  %p427_p5 = pnand %p426_p2, %p420_p0 }
  0x49   : > { %v196_v12 = vadd.f32 %v195_v10, %v189_v11 }
  0x4b   : > { %197 = vst [vmem:[#allocation2] sm:$0x3] %v196_v12 }
  0x52   : > { %v201_v13 = vld [vmem:[#allocation2] sm:$0x3] }
  0x53   : > { %202 = vst [vmem:[%s162_s18] sm:$0x3] %v201_v13 }
  0x54   : > { %430 = shalt.err (!%p427_p5)
}
  0x55   : > { %s431_s22 = scalar_lea.hbm %s643_s12, 32  ;;  %s435_s25 = scalar_lea.hbm %s691_s1, 64 }
  0x56   : > { %p432_p4 = scmp.ne.s32.totalorder %s643_s12, %s431_s22  ;;  %p436_p12 = scmp.lt.u32.totalorder %s643_s12, %s691_s1 }
  0x57   : > { %p437_p1 = scmp.lt.u32.totalorder %s435_s25, %s431_s22  ;;  %p439_p8 = scmp.lt.u32.totalorder %s431_s22, %s643_s12 }
  0x58   : > { %p433_p7 = pnand %p432_p4, %p699_p9 }
  0x59   : > { %p438_p3 = por %p437_p1, %p436_p12 }
  0x5a   : > { %p434_p10 = pneg %p433_p7 }
  0x5b   : > { %p440_p11 = por %p439_p8, %p438_p3 }
  0x5d   : > { %p441_p0 = pnand %p440_p11, %p434_p10 }
  0x5f   : > { %444 = shalt.err (!%p441_p0)
}
  0x60   : > { %324 = dma.vmem_to_hbm [thread:$0]  (%p699_p9), %s638_s29, 32, %s643_s12, %s204_s13  }
  0x61 PF: > { %s230_s3 = sand.u32 1, %s479_s6   ;;  %p700_p6 = scmp.ne.s32.totalorder %s696_s21, 0 }
  0x62   : > { %p701_p13 = scmp.ge.s32.totalorder %s499_s11, 2  ;;  %s231_s4 = scalar_lea.sflag [#allocation5], %s230_s3 }
  0x64   : > { %p331_p2 = pnand %p701_p13, %p700_p6 }
  0x66   : > { %474 = dma.done.wait (!%p331_p2), %s231_s4, 32  }
  0x67   : > { %476 = vsyncadd (!%p331_p2), %s231_s4, 4294967264  ;;  %s17_s11 = sadd.s32 1, %s499_s11   ;;  %s702_s6 = smov %s483_s7 }
  0x68   : > { %p14_p5 = scmp.ge.s32.totalorder %s17_s11, 4   ;;  %s703_s7 = smov %s487_s8 }
  0x69   : > { %s704_s8 = smov %s572_s20  ;;  %s705_s9 = smov %s495_s10 }
  0x6a   : > { %s706_s10 = smov %s708_s14  ;;  %16 = sbr.rel (!%p14_p5) target bundleno = 6 (0x6), region = 80 }
  0x71   :  { %236 = vsyncpa [#allocation4], 1 }
  0x72   :  { %238 = vsyncpa [#allocation4 + $0x1], 1 }
  0x73   :  { %239 = vsyncpa [#allocation5], 1 }
  0x74   :  { %241 = vsyncpa [#allocation5 + $0x1], 1 }

</bundles_post_ra>
